<compile_context>
chip_gen: v7x
topology: tpu7x:2x2x1
jax: 0.10.0
libtpu: 0.0.40
codegen_flags: <defaults>
</compile_context>

<pallas_src>
import numpy as np
import jax
import jax.numpy as jnp
from jax.experimental import pallas as pl
from jax.experimental.pallas import tpu as pltpu


def _round_up(x, m):
    return ((x + m - 1) // m) * m


def made_kernel(x_ref, w1_ref, b1_ref, w2_ref, b2_ref, u_ref,
                logits_ref, sample_ref):
    # x: (TB, d_pad) bf16      w1: (d_pad, h_pad) bf16   b1: (1, h_pad) f32
    # w2: (h_pad, d_pad) bf16  b2: (1, d_pad) f32        u: (TB, d_pad) f32
    x = x_ref[...]

    # masked linear 1 (mask pre-folded into the weights) + bias + ReLU
    h1 = jnp.dot(x, w1_ref[...], preferred_element_type=jnp.float32)
    h1 = jnp.maximum(h1 + b1_ref[...], 0.0)

    # masked linear 2 -> logits (bf16 MXU operands, f32 accumulate/elementwise)
    logits = jnp.dot(h1.astype(jnp.bfloat16), w2_ref[...],
                     preferred_element_type=jnp.float32) + b2_ref[...]
    logits_ref[...] = logits

    # Bernoulli(sigmoid(logits)): compare per-tile uniforms against p.
    p = jax.nn.sigmoid(logits)
    sample_ref[...] = (u_ref[...] < p).astype(jnp.float32)


def made_forward(x_nchw, params, key):
    """Returns (logits, bernoulli_sample), both shaped like x_nchw (NCHW)."""
    B, C, H, W = x_nchw.shape
    d = C * H * W
    w1, m1, b1, w2, m2, b2 = params          # torch layout: w1 (h, d), w2 (d, h)
    h = w1.shape[0]

    # Padded, lane-dense shapes and batch tile.
    d_pad = _round_up(max(d, 128), 128)
    h_pad = _round_up(max(h, 128), 128)
    TB = 128 if B >= 128 else _round_up(B, 16)
    B_pad = _round_up(B, TB)

    # Fold masks into weights, transpose to (K, N), zero-pad, cast to bf16.
    w1m = (w1 * m1).T                         # (d, h)
    w2m = (w2 * m2).T                         # (h, d)
    w1p = jnp.zeros((d_pad, h_pad), jnp.float32).at[:d, :h].set(w1m).astype(jnp.bfloat16)
    w2p = jnp.zeros((h_pad, d_pad), jnp.float32).at[:h, :d].set(w2m).astype(jnp.bfloat16)
    b1p = jnp.zeros((1, h_pad), jnp.float32).at[0, :h].set(b1)
    b2p = jnp.zeros((1, d_pad), jnp.float32).at[0, :d].set(b2)

    x2 = x_nchw.reshape(B, d)
    xp = jnp.zeros((B_pad, d_pad), jnp.float32).at[:B, :d].set(x2).astype(jnp.bfloat16)

    # TODO(synk): pltpu.prng_seed/prng_random_bits would fuse sampling fully
    # on-TPU but has no interpret/CPU lowering; uniforms are drawn here and
    # streamed per batch tile instead (still decorrelated across tiles).
    u = jax.random.uniform(key, (B_pad, d_pad), jnp.float32)

    grid = (B_pad // TB,)
    flops = 2 * 2 * B_pad * d_pad * h_pad
    bytes_accessed = ((w1p.size + w2p.size + xp.size) * 2      # bf16 operands
                      + (b1p.size + b2p.size + u.size) * 4     # f32 inputs
                      + 2 * B_pad * d_pad * 4)                 # f32 outputs

    logits_p, sample_p = pl.pallas_call(
        made_kernel,
        out_shape=(jax.ShapeDtypeStruct((B_pad, d_pad), jnp.float32),
                   jax.ShapeDtypeStruct((B_pad, d_pad), jnp.float32)),
        grid=grid,
        in_specs=[
            pl.BlockSpec((TB, d_pad), lambda i: (i, 0)),      # x tile
            pl.BlockSpec((d_pad, h_pad), lambda i: (0, 0)),   # w1 (VMEM-resident)
            pl.BlockSpec((1, h_pad), lambda i: (0, 0)),       # b1
            pl.BlockSpec((h_pad, d_pad), lambda i: (0, 0)),   # w2 (VMEM-resident)
            pl.BlockSpec((1, d_pad), lambda i: (0, 0)),       # b2
            pl.BlockSpec((TB, d_pad), lambda i: (i, 0)),      # uniforms tile
        ],
        out_specs=(pl.BlockSpec((TB, d_pad), lambda i: (i, 0)),
                   pl.BlockSpec((TB, d_pad), lambda i: (i, 0))),
        compiler_params=pltpu.CompilerParams(
            dimension_semantics=("parallel",),
            vmem_limit_bytes=64 * 1024 * 1024),
        cost_estimate=pl.CostEstimate(
            flops=flops,
            transcendentals=B_pad * d_pad,
            bytes_accessed=bytes_accessed),
    )(xp, w1p, b1p, w2p, b2p, u)

    logits = logits_p[:B, :d].reshape(B, C, H, W)
    sample = sample_p[:B, :d].reshape(B, C, H, W)
    return logits, sample


def generate_masks(d, h, seed=1000):
    """Replicates MADE.generate_mask logic (l=1, n_mask=1) with numpy RNG.

    Not bit-identical to torch.Generator draws, but same construction:
    connections[0] = permutation(d); connections[1] = randint(0, d-1, (h,));
    connections[2] = connections[0];
    mask1[j,i] = c0[i] <= c1[j]; mask2[j,i] = c1[i] < c2[j].
    """
    rng = np.random.default_rng(seed)
    first_order = rng.permutation(d)
    last_order = first_order
    c0 = first_order
    c1 = rng.integers(0, d - 1, size=(h,))    # torch.randint(0, d-1) excludes d-1
    c2 = last_order
    mask1 = (c0[None, :] <= c1[:, None]).astype(np.float32)   # (h, d)
    mask2 = (c1[None, :] < c2[:, None]).astype(np.float32)    # (d, h)
    order = np.argsort(first_order)
    return mask1, mask2, order


if __name__ == "__main__":
    # Small shapes: MADE(d=64, h=128, l=1, n_mask=1) on NCHW input (2, 4, 4, 4).
    B, C, H, W = 2, 4, 4, 4
    d = C * H * W          # 64
    hdim = 128

    # Deterministic parameter init (nn.Linear-style uniform bounds).
    key = jax.random.PRNGKey(0)
    k1, k2, k3, k4, kx, ks = jax.random.split(key, 6)
    bound1 = 1.0 / np.sqrt(d)
    bound2 = 1.0 / np.sqrt(hdim)
    w1 = jax.random.uniform(k1, (hdim, d), jnp.float32, -bound1, bound1)
    b1 = jax.random.uniform(k2, (hdim,), jnp.float32, -bound1, bound1)
    w2 = jax.random.uniform(k3, (d, hdim), jnp.float32, -bound2, bound2)
    b2 = jax.random.uniform(k4, (d,), jnp.float32, -bound2, bound2)

    # TODO(synk): torch.Generator-exact permutation/randint draws are not
    # reproducible in JAX; masks use an equivalent deterministic numpy RNG.
    m1_np, m2_np, order = generate_masks(d, hdim, seed=1000)
    m1 = jnp.asarray(m1_np)
    m2 = jnp.asarray(m2_np)

    x = jax.random.uniform(kx, (B, C, H, W), jnp.float32)

    logits, sample = made_forward(x, (w1, m1, b1, w2, m2, b2), key=ks)
    jax.block_until_ready((logits, sample))

    assert logits.shape == (B, C, H, W) and sample.shape == (B, C, H, W)
    assert bool(jnp.all((sample == 0.0) | (sample == 1.0)))
    assert bool(jnp.all(jnp.isfinite(logits)))
    print("KERNEL_OK")
</pallas_src>

<mosaic_0001>
module attributes {stable_mosaic.version = 11 : i64} {
  func.func @made_kernel(%arg0: i32, %arg1: memref<16x128xbf16, #tpu.memory_space<vmem>>, %arg2: memref<128x128xbf16, #tpu.memory_space<vmem>>, %arg3: memref<1x128xf32, #tpu.memory_space<vmem>>, %arg4: memref<128x128xbf16, #tpu.memory_space<vmem>>, %arg5: memref<1x128xf32, #tpu.memory_space<vmem>>, %arg6: memref<16x128xf32, #tpu.memory_space<vmem>>, %arg7: memref<16x128xf32, #tpu.memory_space<vmem>>, %arg8: memref<16x128xf32, #tpu.memory_space<vmem>>) attributes {dimension_semantics = [#tpu.dimension_semantics<parallel>], iteration_bounds = array<i64: 1>, scalar_prefetch = 0 : i64, scratch_operands = 0 : i64, tpu.core_type = #tpu.core_type<tc>, window_params = [{transform_indices = @transform_0, window_bounds = array<i64: 16, 128>}, {pipeline_mode = #tpu.pipeline_mode<synchronous>, transform_indices = @transform_1, window_bounds = array<i64: 128, 128>}, {pipeline_mode = #tpu.pipeline_mode<synchronous>, transform_indices = @transform_2, window_bounds = array<i64: 1, 128>}, {pipeline_mode = #tpu.pipeline_mode<synchronous>, transform_indices = @transform_3, window_bounds = array<i64: 128, 128>}, {pipeline_mode = #tpu.pipeline_mode<synchronous>, transform_indices = @transform_4, window_bounds = array<i64: 1, 128>}, {transform_indices = @transform_5, window_bounds = array<i64: 16, 128>}, {transform_indices = @transform_6, window_bounds = array<i64: 16, 128>}, {transform_indices = @transform_7, window_bounds = array<i64: 16, 128>}]} {
    %c0 = arith.constant 0 : index
    %c0_0 = arith.constant 0 : index
    %0 = vector.load %arg1[%c0, %c0_0] : memref<16x128xbf16, #tpu.memory_space<vmem>>, vector<16x128xbf16>
    %c0_1 = arith.constant 0 : index
    %c0_2 = arith.constant 0 : index
    %1 = vector.load %arg2[%c0_1, %c0_2] : memref<128x128xbf16, #tpu.memory_space<vmem>>, vector<128x128xbf16>
    %cst = arith.constant dense<0.000000e+00> : vector<16x128xf32>
    %2 = tpu.matmul %0, %1, %cst {dimension_numbers = #tpu.dot_dimension_numbers<[1], [0], [0], [1], [0, 0, 1, 1], [], []>} : vector<16x128xbf16>, vector<128x128xbf16>, vector<16x128xf32> -> vector<16x128xf32>
    %c0_3 = arith.constant 0 : index
    %c0_4 = arith.constant 0 : index
    %3 = vector.load %arg3[%c0_3, %c0_4] : memref<1x128xf32, #tpu.memory_space<vmem>>, vector<1x128xf32>
    %4 = vector.broadcast %3 : vector<1x128xf32> to vector<16x128xf32>
    %5 = arith.addf %2, %4 : vector<16x128xf32>
    %cst_5 = arith.constant 0.000000e+00 : f32
    %6 = vector.broadcast %cst_5 : f32 to vector<16x128xf32>
    %7 = arith.maximumf %5, %6 : vector<16x128xf32>
    %8 = arith.truncf %7 : vector<16x128xf32> to vector<16x128xbf16>
    %c0_6 = arith.constant 0 : index
    %c0_7 = arith.constant 0 : index
    %9 = vector.load %arg4[%c0_6, %c0_7] : memref<128x128xbf16, #tpu.memory_space<vmem>>, vector<128x128xbf16>
    %cst_8 = arith.constant dense<0.000000e+00> : vector<16x128xf32>
    %10 = tpu.matmul %8, %9, %cst_8 {dimension_numbers = #tpu.dot_dimension_numbers<[1], [0], [0], [1], [0, 0, 1, 1], [], []>} : vector<16x128xbf16>, vector<128x128xbf16>, vector<16x128xf32> -> vector<16x128xf32>
    %c0_9 = arith.constant 0 : index
    %c0_10 = arith.constant 0 : index
    %11 = vector.load %arg5[%c0_9, %c0_10] : memref<1x128xf32, #tpu.memory_space<vmem>>, vector<1x128xf32>
    %12 = vector.broadcast %11 : vector<1x128xf32> to vector<16x128xf32>
    %13 = arith.addf %10, %12 : vector<16x128xf32>
    %c0_11 = arith.constant 0 : index
    %c0_12 = arith.constant 0 : index
    %14 = vector.load %arg7[%c0_11, %c0_12] : memref<16x128xf32, #tpu.memory_space<vmem>>, vector<16x128xf32>
    tpu.vector_store %arg7[%c0_11, %c0_12], %13 {strides = array<i32>} : memref<16x128xf32, #tpu.memory_space<vmem>>, vector<16x128xf32>,
    %15 = arith.negf %13 : vector<16x128xf32>
    %16 = math.exp %15 : vector<16x128xf32>
    %cst_13 = arith.constant 1.000000e+00 : f32
    %17 = vector.broadcast %cst_13 : f32 to vector<16x128xf32>
    %18 = arith.addf %17, %16 : vector<16x128xf32>
    %19 = arith.divf %17, %18 : vector<16x128xf32>
    %c0_14 = arith.constant 0 : index
    %c0_15 = arith.constant 0 : index
    %20 = vector.load %arg6[%c0_14, %c0_15] : memref<16x128xf32, #tpu.memory_space<vmem>>, vector<16x128xf32>
    %21 = arith.cmpf olt, %20, %19 : vector<16x128xf32>
    %22 = arith.extui %21 : vector<16x128xi1> to vector<16x128xi32>
    %23 = arith.sitofp %22 : vector<16x128xi32> to vector<16x128xf32>
    %c0_16 = arith.constant 0 : index
    %c0_17 = arith.constant 0 : index
    %24 = vector.load %arg8[%c0_16, %c0_17] : memref<16x128xf32, #tpu.memory_space<vmem>>, vector<16x128xf32>
    tpu.vector_store %arg8[%c0_16, %c0_17], %23 {strides = array<i32>} : memref<16x128xf32, #tpu.memory_space<vmem>>, vector<16x128xf32>,
    return
  }
  func.func @transform_0(%arg0: i32) -> (i32, i32) {
    %c0_i32 = arith.constant 0 : i32
    %c0_i32_0 = arith.constant 0 : i32
    return %arg0, %c0_i32 : i32, i32
  }
  func.func @transform_1(%arg0: i32) -> (i32, i32) {
    %c0_i32 = arith.constant 0 : i32
    %c0_i32_0 = arith.constant 0 : i32
    %c0_i32_1 = arith.constant 0 : i32
    return %c0_i32, %c0_i32_0 : i32, i32
  }
  func.func @transform_2(%arg0: i32) -> (i32, i32) {
    %c0_i32 = arith.constant 0 : i32
    %c0_i32_0 = arith.constant 0 : i32
    %c0_i32_1 = arith.constant 0 : i32
    return %c0_i32, %c0_i32_0 : i32, i32
  }
  func.func @transform_3(%arg0: i32) -> (i32, i32) {
    %c0_i32 = arith.constant 0 : i32
    %c0_i32_0 = arith.constant 0 : i32
    %c0_i32_1 = arith.constant 0 : i32
    return %c0_i32, %c0_i32_0 : i32, i32
  }
  func.func @transform_4(%arg0: i32) -> (i32, i32) {
    %c0_i32 = arith.constant 0 : i32
    %c0_i32_0 = arith.constant 0 : i32
    %c0_i32_1 = arith.constant 0 : i32
    return %c0_i32, %c0_i32_0 : i32, i32
  }
  func.func @transform_5(%arg0: i32) -> (i32, i32) {
    %c0_i32 = arith.constant 0 : i32
    %c0_i32_0 = arith.constant 0 : i32
    return %arg0, %c0_i32 : i32, i32
  }
  func.func @transform_6(%arg0: i32) -> (i32, i32) {
    %c0_i32 = arith.constant 0 : i32
    %c0_i32_0 = arith.constant 0 : i32
    return %arg0, %c0_i32 : i32, i32
  }
  func.func @transform_7(%arg0: i32) -> (i32, i32) {
    %c0_i32 = arith.constant 0 : i32
    %c0_i32_0 = arith.constant 0 : i32
    return %arg0, %c0_i32 : i32, i32
  }
}

</mosaic_0001>

<bundles_post_ra>
// kernel: tpu_custom_call.1
= control target key start
LH: loop header
LB: loop body
LE: loop exit
PB: predicated region body
PF: predicated region fallthrough
CT: control target
= control target key end

     0   :  { %13 = vsyncpa [#allocation3], 0  ;;  %s911_s0 = inlined_call_operand.hbm [shape: bf16[16,128], index: 0, kind: input, shape index: {}]   ;;  %s912_s1 = inlined_call_operand.hbm [shape: bf16[128,128], index: 1, kind: input, shape index: {}]   ;;  %s913_s2 = inlined_call_operand.hbm [shape: f32[1,128], index: 2, kind: input, shape index: {}]   ;;  %s914_s3 = inlined_call_operand.hbm [shape: bf16[128,128], index: 3, kind: input, shape index: {}]   ;;  %s915_s4 = inlined_call_operand.hbm [shape: f32[1,128], index: 4, kind: input, shape index: {}]   ;;  %s916_s5 = inlined_call_operand.hbm [shape: f32[16,128], index: 5, kind: input, shape index: {}]   ;;  %s917_s6 = inlined_call_operand.hbm [shape: f32[16,128], index: 6, kind: output, shape index: {0}]   ;;  %s918_s7 = inlined_call_operand.hbm [shape: f32[16,128], index: 7, kind: output, shape index: {1}]  }
   0x1   :  { %14 = vsyncpa [#allocation6], 0 }
   0x2   :  { %15 = vsyncpa [#allocation9], 0 }
   0x3   :  { %16 = vsyncpa [#allocation12], 0 }
   0x4   :  { %17 = vsyncpa [#allocation4], 0 }
   0x5   :  { %18 = vsyncpa [#allocation15], 0  ;;  %s709_s24 = smov [#allocation5]   ;;  %s710_s26 = smov [#allocation8]  }
   0x6   :  { %s36_s25 = sshll.u32 %s709_s24, 4  ;;  %s58_s27 = sshll.u32 %s710_s26, 4  ;;  %s37_s25 = int_to_ptr.vmem [resolvable:$true] %s36_s25  ;;  %s763_s27 = int_to_ptr.vmem [resolvable:$true] %s58_s27 }
   0x7   :  { %s521_s30 = scalar_lea.hbm %s912_s1, 1024 }
   0x8   :  { %p522_p0 = scmp.ne.s32.totalorder %s912_s1, %s521_s30  ;;  %p525_p1 = scmp.lt.u32.totalorder %s521_s30, %s912_s1 }
   0xa   :  { %p527_p2 = pnand %p525_p1, %p522_p0 }
   0xc   :  { %530 = shalt.err (!%p527_p2)
}
   0xd   :  { %s531_s12 = scalar_lea.vmem %s37_s25, 1024  ;;  %p536_p4 = scmp.lt.s32.totalorder %s37_s25, %s37_s25 }
   0xe   :  { %p532_p3 = scmp.ne.s32.totalorder %s37_s25, %s531_s12  ;;  %p537_p5 = scmp.lt.s32.totalorder %s531_s12, %s531_s12 }
  0x10   :  { %p538_p6 = por %p537_p5, %p536_p4 }
  0x12   :  { %p539_p7 = pnand %p538_p6, %p532_p3 }
  0x14   :  { %542 = shalt.err (!%p539_p7)
}
  0x15   :  { %s711_s13 = smov 64   ;;  %s712_s14 = smov 4  }
  0x16   :  { %42 = dma.hbm_to_vmem [thread:$0]  %s912_s1, 1024, %s37_s25, [#allocation6], %s711_s13, %s711_s13, %s712_s14  }
  0x17   :  { %s543_s19 = scalar_lea.hbm %s914_s3, 1024 }
  0x18   :  { %p544_p8 = scmp.ne.s32.totalorder %s914_s3, %s543_s19  ;;  %p547_p9 = scmp.lt.u32.totalorder %s543_s19, %s914_s3 }
  0x1a   :  { %p549_p10 = pnand %p547_p9, %p544_p8 }
  0x1c   :  { %552 = shalt.err (!%p549_p10)
}
  0x1d   :  { %s553_s24 = scalar_lea.vmem %s763_s27, 1024  ;;  %p558_p12 = scmp.lt.s32.totalorder %s763_s27, %s763_s27 }
  0x1e   :  { %p554_p11 = scmp.ne.s32.totalorder %s763_s27, %s553_s24  ;;  %p559_p13 = scmp.lt.s32.totalorder %s553_s24, %s553_s24 }
  0x20   :  { %p560_p0 = por %p559_p13, %p558_p12 }
  0x22   :  { %p561_p1 = pnand %p560_p0, %p554_p11 }
  0x24   :  { %564 = shalt.err (!%p561_p1)
}
  0x25   :  { %64 = dma.hbm_to_vmem [thread:$0]  %s914_s3, 1024, %s763_s27, [#allocation9], %s711_s13, %s711_s13, %s712_s14  }
  0x26   :  { %s713_s26 = smov [#allocation2]   ;;  %s714_s29 = smov [#allocation7]  }
  0x27   :  { %s24_s28 = sshll.u32 %s713_s26, 4  ;;  %s49_s30 = sshll.u32 %s714_s29, 4  ;;  %s25_s28 = int_to_ptr.vmem [resolvable:$true] %s24_s28  ;;  %s50_s30 = int_to_ptr.vmem [resolvable:$true] %s49_s30 }
  0x28   :  { %s565_s10 = scalar_lea.hbm %s911_s0, 128 }
  0x29   :  { %p566_p2 = scmp.ne.s32.totalorder %s911_s0, %s565_s10  ;;  %p569_p3 = scmp.lt.u32.totalorder %s565_s10, %s911_s0 }
  0x2b   :  { %p571_p4 = pnand %p569_p3, %p566_p2 }
  0x2d   :  { %574 = shalt.err (!%p571_p4)
}
  0x2e   :  { %s575_s3 = scalar_lea.vmem %s25_s28, 128  ;;  %p580_p6 = scmp.lt.s32.totalorder %s25_s28, %s25_s28 }
  0x2f   :  { %p576_p5 = scmp.ne.s32.totalorder %s25_s28, %s575_s3  ;;  %p581_p7 = scmp.lt.s32.totalorder %s575_s3, %s575_s3 }
  0x31   :  { %p582_p8 = por %p581_p7, %p580_p6 }
  0x33   :  { %p583_p9 = pnand %p582_p8, %p576_p5 }
  0x35   :  { %586 = shalt.err (!%p583_p9)
}
  0x36   :  { %30 = dma.hbm_to_vmem [thread:$0]  %s911_s0, 128, %s25_s28, [#allocation3], %s711_s13, %s711_s13, %s712_s14  }
  0x37   :  { %s587_s20 = scalar_lea.hbm %s913_s2, 16 }
  0x38   :  { %p588_p10 = scmp.ne.s32.totalorder %s913_s2, %s587_s20  ;;  %p591_p11 = scmp.lt.u32.totalorder %s587_s20, %s913_s2 }
  0x3a   :  { %p593_p12 = pnand %p591_p11, %p588_p10 }
  0x3c   :  { %596 = shalt.err (!%p593_p12)
}
  0x3d   :  { %s597_s1 = scalar_lea.vmem %s50_s30, 16  ;;  %s601_s25 = scalar_lea.vmem %s50_s30, 32 }
  0x3e   :  { %p598_p13 = scmp.ne.s32.totalorder %s50_s30, %s597_s1  ;;  %p602_p0 = scmp.lt.s32.totalorder %s50_s30, %s50_s30 }
  0x3f   :  { %p603_p1 = scmp.lt.s32.totalorder %s601_s25, %s597_s1 }
  0x41   :  { %p604_p2 = por %p603_p1, %p602_p0 }
  0x43   :  { %p605_p3 = pnand %p604_p2, %p598_p13 }
  0x45   :  { %608 = shalt.err (!%p605_p3)
}
  0x46   :  { %52 = dma.hbm_to_vmem [thread:$0]  %s913_s2, 16, %s50_s30, [#allocation6]  }
  0x47   :  { %s715_s14 = smov [#allocation10]   ;;  %s716_s28 = smov [#allocation11]  }
  0x48   :  { %s71_s26 = sshll.u32 %s715_s14, 4  ;;  %s80_s29 = sshll.u32 %s716_s28, 4  ;;  %s72_s26 = int_to_ptr.vmem [resolvable:$true] %s71_s26  ;;  %s827_s29 = int_to_ptr.vmem [resolvable:$true] %s80_s29 }
  0x49   :  { %s609_s10 = scalar_lea.hbm %s915_s4, 16 }
  0x4a   :  { %p610_p4 = scmp.ne.s32.totalorder %s915_s4, %s609_s10  ;;  %p613_p5 = scmp.lt.u32.totalorder %s609_s10, %s915_s4 }
  0x4c   :  { %p615_p6 = pnand %p613_p5, %p610_p4 }
  0x4e   :  { %618 = shalt.err (!%p615_p6)
}
  0x4f   :  { %s619_s2 = scalar_lea.vmem %s72_s26, 16  ;;  %s623_s30 = scalar_lea.vmem %s72_s26, 32 }
  0x50   :  { %p620_p7 = scmp.ne.s32.totalorder %s72_s26, %s619_s2  ;;  %p624_p8 = scmp.lt.s32.totalorder %s72_s26, %s72_s26 }
  0x51   :  { %p625_p9 = scmp.lt.s32.totalorder %s623_s30, %s619_s2 }
  0x53   :  { %p626_p10 = por %p625_p9, %p624_p8 }
  0x55   :  { %p627_p11 = pnand %p626_p10, %p620_p7 }
  0x57   :  { %630 = shalt.err (!%p627_p11)
}
  0x58   :  { %74 = dma.hbm_to_vmem [thread:$0]  %s915_s4, 16, %s72_s26, [#allocation9]  }
  0x59   :  { %s631_s19 = scalar_lea.hbm %s916_s5, 256 }
  0x5a   :  { %p632_p12 = scmp.ne.s32.totalorder %s916_s5, %s631_s19  ;;  %p635_p13 = scmp.lt.u32.totalorder %s631_s19, %s916_s5 }
  0x5c   :  { %p637_p0 = pnand %p635_p13, %p632_p12 }
  0x5e   :  { %640 = shalt.err (!%p637_p0)
}
  0x5f   :  { %s641_s24 = scalar_lea.vmem %s827_s29, 256  ;;  %p646_p2 = scmp.lt.s32.totalorder %s827_s29, %s827_s29 }
  0x60   :  { %p642_p1 = scmp.ne.s32.totalorder %s827_s29, %s641_s24  ;;  %p647_p3 = scmp.lt.s32.totalorder %s641_s24, %s641_s24 }
  0x62   :  { %p648_p4 = por %p647_p3, %p646_p2 }
  0x64   :  { %p649_p5 = pnand %p648_p4, %p642_p1 }
  0x66   :  { %652 = shalt.err (!%p649_p5)
}
  0x67   :  { %s717_s4 = smov 128   ;;  %s718_s1 = smov 8  }
  0x68   :  { %86 = dma.hbm_to_vmem [thread:$0]  %s916_s5, 256, %s827_s29, [#allocation12], %s717_s4, %s717_s4, %s718_s1  }
  0x69   :  { %697 = dma.done.wait [#allocation3], 128  }
  0x6a   :  { %698 = vsyncadd [#allocation3], 4294967168 }
  0x6b   :  { %699 = dma.done.wait [#allocation6], 1040  }
  0x6c   :  { %700 = vsyncadd [#allocation6], 4294966256 }
  0x6d   :  { %701 = dma.done.wait [#allocation9], 1040  }
  0x6e   :  { %702 = vsyncadd [#allocation9], 4294966256 }
  0x6f   :  { %703 = dma.done.wait [#allocation12], 256  }
  0x70   :  { %704 = vsyncadd [#allocation12], 4294967040  ;;  %v719_v0 = vmov 0.0   ;;  %vm720_vm0 = vmmov 0   ;;  %v496_v1 = vld [vmem:[#allocation5] sm:$0xff]   ;;  %v497_v2 = vld [vmem:[#allocation5 + $0x8] sm:$0xff]  }
  0x71   :  { %442 = vmatprep.subr.bf16.mxu0 %v719_v0  ;;  %458 = vmatprep.mubr.msk.bf16.mxu0 %vm720_vm0, %v719_v0  ;;  %v498_v3 = vld [vmem:[#allocation5 + $0x10] sm:$0xff]   ;;  %v505_v4 = vld [vmem:[#allocation8] sm:$0xff]   ;;  %v499_v5 = vld [vmem:[#allocation5 + $0x18] sm:$0xff]   ;;  %s721_s5 = smov [#allocation13]  }
  0x72   :  { %462 = vmatprep.subr.bf16.mxu1 %v719_v0  ;;  %478 = vmatprep.mubr.msk.bf16.mxu1 %vm720_vm0, %v719_v0  ;;  %v506_v6 = vld [vmem:[#allocation8 + $0x8] sm:$0xff]   ;;  %v500_v7 = vld [vmem:[#allocation5 + $0x20] sm:$0xff]   ;;  %v507_v8 = vld [vmem:[#allocation8 + $0x10] sm:$0xff]   ;;  %s370_s13 = sshll.u32 %s721_s5, 4  ;;  %s371_s13 = int_to_ptr.vmem [resolvable:$true] %s370_s13 }
  0x73   :  { %443 = vmatpush3.bf16.msra.mxu0 %v496_v1  ;;  %463 = vmatpush3.bf16.msra.mxu1 %v505_v4  ;;  %v501_v9 = vld [vmem:[#allocation5 + $0x28] sm:$0xff]   ;;  %v508_v10 = vld [vmem:[#allocation8 + $0x18] sm:$0xff]   ;;  %v502_v11 = vld [vmem:[#allocation5 + $0x30] sm:$0xff]   ;;  %s653_s14 = scalar_lea.vmem %s371_s13, 256  ;;  %p658_p7 = scmp.lt.s32.totalorder %s371_s13, %s371_s13 }
  0x74   :  { %444 = vmatprep.subr.bf16.mxu0 %v719_v0  ;;  %464 = vmatprep.subr.bf16.mxu1 %v719_v0  ;;  %v509_v12 = vld [vmem:[#allocation8 + $0x20] sm:$0xff]   ;;  %v503_v13 = vld [vmem:[#allocation5 + $0x38] sm:$0xff]   ;;  %v510_v14 = vld [vmem:[#allocation8 + $0x28] sm:$0xff]   ;;  %p654_p6 = scmp.ne.s32.totalorder %s371_s13, %s653_s14  ;;  %p659_p8 = scmp.lt.s32.totalorder %s653_s14, %s653_s14 }
  0x75   :  { %v504_v15 = vld [vmem:[#allocation2] sm:$0xff]   ;;  %v401_v18 = vld [vmem:[#allocation7] ss:$0 sm:$0xff]  ;;  %v411_v28 = vld [vmem:[#allocation10] ss:$0 sm:$0xff] }
  0x76   :  { %v511_v16 = vld [vmem:[#allocation8 + $0x30] sm:$0xff]   ;;  %v512_v17 = vld [vmem:[#allocation8 + $0x38] sm:$0xff]   ;;  %p660_p9 = por %p659_p8, %p658_p7 }
  0x77   :  { %445 = vmatpush3.bf16.msra.mxu0 %v497_v2  ;;  %465 = vmatpush3.bf16.msra.mxu1 %v506_v6 }
  0x78   :  { %446 = vmatprep.subr.bf16.mxu0 %v719_v0  ;;  %466 = vmatprep.subr.bf16.mxu1 %v719_v0  ;;  %p661_p10 = pnand %p660_p9, %p654_p6 }
  0x7b   :  { %447 = vmatpush3.bf16.msra.mxu0 %v498_v3  ;;  %467 = vmatpush3.bf16.msra.mxu1 %v507_v8 }
  0x7c   :  { %448 = vmatprep.subr.bf16.mxu0 %v719_v0  ;;  %468 = vmatprep.subr.bf16.mxu1 %v719_v0 }
  0x7f   :  { %449 = vmatpush3.bf16.msra.mxu0 %v499_v5  ;;  %469 = vmatpush3.bf16.msra.mxu1 %v508_v10 }
  0x80   :  { %450 = vmatprep.subr.bf16.mxu0 %v719_v0  ;;  %470 = vmatprep.subr.bf16.mxu1 %v719_v0 }
  0x83   :  { %451 = vmatpush3.bf16.msra.mxu0 %v500_v7  ;;  %471 = vmatpush3.bf16.msra.mxu1 %v509_v12 }
  0x84   :  { %452 = vmatprep.subr.bf16.mxu0 %v719_v0  ;;  %472 = vmatprep.subr.bf16.mxu1 %v719_v0 }
  0x87   :  { %453 = vmatpush3.bf16.msra.mxu0 %v501_v9  ;;  %473 = vmatpush3.bf16.msra.mxu1 %v510_v14 }
  0x88   :  { %454 = vmatprep.subr.bf16.mxu0 %v719_v0  ;;  %474 = vmatprep.subr.bf16.mxu1 %v719_v0 }
  0x8b   :  { %455 = vmatpush3.bf16.msra.mxu0 %v502_v11  ;;  %475 = vmatpush3.bf16.msra.mxu1 %v511_v16 }
  0x8c   :  { %456 = vmatprep.subr.bf16.mxu0 %v719_v0  ;;  %476 = vmatprep.subr.bf16.mxu1 %v719_v0 }
  0x8f   :  { %457 = vmatpush3.bf16.msra.mxu0 %v503_v13  ;;  %477 = vmatpush3.bf16.msra.mxu1 %v512_v17 }
  0x92   :  { %459 = vmatmul.mubr.bf16.vlgmr.msra.gmra.mrb[0].mxu0 %v504_v15 }
 0x165   :  { %v219_v19 = vpop.f32.mrb[0].mxu0 }
 0x166   :  { %v220_v20 = vadd.f32 %v401_v18, %v219_v19  ;;  %v460_v21 = vpop.f32.mrb[1].mxu0 }
 0x167   :  { %v222_v22 = vpop.f32.mrb[2].mxu0 }
 0x168   :  { %v223_v23 = vadd.f32 %v401_v18, %v222_v22  ;;  %v461_v24 = vpop.f32.mrb[3].mxu0  ;;  %v226_v25 = vmax.f32 %v220_v20, 0.0 }
 0x16a   :  { %v227_v26 = vmax.f32 %v223_v23, 0.0 }
 0x16c   :  { %v228_v27 = vpack.c.bf16 %v227_v26, %v226_v25 }
 0x16e   :  { %479 = vmatmul.mubr.bf16.vlgmr.msra.gmra.mrb[0].mxu1 %v228_v27 }
 0x241   :  { %v334_v29 = vpop.f32.mrb[0].mxu1 }
 0x242   :  { %v335_v30 = vadd.f32 %v411_v28, %v334_v29  ;;  %v480_v31 = vpop.f32.mrb[1].mxu1 }
 0x243   :  { %v337_v32 = vpop.f32.mrb[2].mxu1 }
 0x244   :  { %341 = vst [vmem:[#allocation13] sm:$0xff] %v335_v30  ;;  %v420_v33 = vmul.f32 -1.442695, %v335_v30  ;;  %v338_v34 = vadd.f32 %v411_v28, %v337_v32  ;;  %v481_v35 = vpop.f32.mrb[3].mxu1 }
 0x246   :  { %513 = vpow2.f32 %v420_v33  ;;  %342 = vst [vmem:[#allocation13 + $0x8] sm:$0xff] %v338_v34  ;;  %v421_v36 = vmul.f32 -1.442695, %v338_v34 }
 0x247   :  { %664 = shalt.err (!%p661_p10)
}
 0x248   :  { %s665_s29 = scalar_lea.hbm %s917_s6, 256 }
 0x249   :  { %p666_p11 = scmp.ne.s32.totalorder %s917_s6, %s665_s29  ;;  %p669_p12 = scmp.lt.u32.totalorder %s665_s29, %s917_s6 }
 0x24b   :  { %p671_p13 = pnand %p669_p12, %p666_p11 }
 0x24d   :  { %674 = shalt.err (!%p671_p13)
}
 0x24e   :  { %376 = dma.vmem_to_hbm [thread:$0]  %s371_s13, 256, %s917_s6, [#allocation4], %s717_s4, %s717_s4, %s718_s1   ;;  %515 = vpow2.f32 %v421_v36  ;;  %v355_v41 = vld [vmem:[#allocation11] sm:$0xff]  ;;  %v356_v43 = vld [vmem:[#allocation11 + $0x8] sm:$0xff] }
 0x24f   :  { %s722_s16 = smov [#allocation14]  }
 0x250   :  { %v514_v37 = vpop.eup %513  ;;  %s382_s2 = sshll.u32 %s722_s16, 4  ;;  %s383_s2 = int_to_ptr.vmem [resolvable:$true] %s382_s2 }
 0x251   :  { %v349_v38 = vadd.f32 1.0, %v514_v37  ;;  %s675_s6 = scalar_lea.vmem %s383_s2, 256  ;;  %p680_p1 = scmp.lt.s32.totalorder %s383_s2, %s383_s2 }
 0x252   :  { %p676_p0 = scmp.ne.s32.totalorder %s383_s2, %s675_s6  ;;  %p681_p2 = scmp.lt.s32.totalorder %s675_s6, %s675_s6 }
 0x253   :  { %517 = vrcp.f32 %v349_v38 }
 0x254   :  { %p682_p3 = por %p681_p2, %p680_p1 }
 0x256   :  { %p683_p4 = pnand %p682_p3, %p676_p0 }
 0x258   :  { %v516_v39 = vpop.eup %515 }
 0x259   :  { %v350_v40 = vadd.f32 1.0, %v516_v39 }
 0x25b   :  { %519 = vrcp.f32 %v350_v40 }
 0x25d   :  { %v518_v42 = vpop.eup %517 }
 0x25e   :  { %vm357_vm1 = vcmp.lt.f32.partialorder %v355_v41, %v518_v42 }
 0x25f   :  { %v422_v45 = vsel %vm357_vm1, 1.0, %v719_v0 }
 0x260   :  { %363 = vst [vmem:[#allocation14] sm:$0xff] %v422_v45 }
 0x265   :  { %v520_v44 = vpop.eup %519 }
 0x266   :  { %vm358_vm2 = vcmp.lt.f32.partialorder %v356_v43, %v520_v44 }
 0x267   :  { %v423_v46 = vsel %vm358_vm2, 1.0, %v719_v0 }
 0x268   :  { %364 = vst [vmem:[#allocation14 + $0x8] sm:$0xff] %v423_v46 }
 0x269   :  { %686 = shalt.err (!%p683_p4)
}
 0x26a   :  { %s687_s27 = scalar_lea.hbm %s918_s7, 256 }
 0x26b   :  { %p688_p5 = scmp.ne.s32.totalorder %s918_s7, %s687_s27  ;;  %p691_p6 = scmp.lt.u32.totalorder %s687_s27, %s918_s7 }
 0x26d   :  { %p693_p7 = pnand %p691_p6, %p688_p5 }
 0x26f   :  { %696 = shalt.err (!%p693_p7)
}
 0x270   :  { %388 = dma.vmem_to_hbm [thread:$0]  %s383_s2, 256, %s918_s7, [#allocation15], %s717_s4, %s717_s4, %s718_s1  }
 0x271   :  { %705 = dma.done.wait [#allocation4], 256  }
 0x272   :  { %706 = vsyncadd [#allocation4], 4294967040 }
 0x273   :  { %707 = dma.done.wait [#allocation15], 256  }
 0x274   :  { %708 = vsyncadd [#allocation15], 4294967040 }
 0x275   :  { %395 = vsyncpa [#allocation3], 1 }
 0x276   :  { %396 = vsyncpa [#allocation6], 1 }
 0x277   :  { %397 = vsyncpa [#allocation9], 1 }
 0x278   :  { %398 = vsyncpa [#allocation12], 1 }
 0x279   :  { %399 = vsyncpa [#allocation4], 1 }
 0x27a   :  { %400 = vsyncpa [#allocation15], 1 }

</bundles_post_ra>
